<compile_context>
chip_gen: v6e
topology: v6e:2x2x1
jax: 0.10.0
libtpu: 0.0.40
codegen_flags: <defaults>
</compile_context>

<pallas_src>
import functools

import jax
import jax.numpy as jnp
from jax.experimental import pallas as pl
from jax.experimental.pallas import tpu as pltpu


# ----------------------------------------------------------------------------
# Kernel 1 (fused): cosine distance + k-smallest selection + freq counts + sim loss
#   dist[b, j]  = 1 - cos_sim(normalize(v[b]), normalize(k[j]))
#   sel[b, :]   = indices of the num_sel smallest (dist * weights) per row
#   counts[j]   = how many times prompt j was selected across the batch
#   loss        = mean_b sum_k dist[b, sel[b, k]]
# ----------------------------------------------------------------------------
def _select_kernel(v_ref, k_ref, w_ref, dist_ref, sel_ref, cnt_ref, loss_ref,
                   *, num_sel):
    v = v_ref[...].astype(jnp.float32)                         # (B, D)
    ky = k_ref[...].astype(jnp.float32)                        # (P, D)
    # rsqrt goes to the EUP slot (vs sqrt+divide on the VPU)
    v_n = v * jax.lax.rsqrt(jnp.maximum(jnp.sum(v * v, axis=-1, keepdims=True), 1e-24))
    k_n = ky * jax.lax.rsqrt(jnp.maximum(jnp.sum(ky * ky, axis=-1, keepdims=True), 1e-24))
    dist = 1.0 - jnp.dot(v_n, k_n.T, preferred_element_type=jnp.float32)   # (B, P) on MXU
    dist_ref[...] = dist

    b_dim, p_dim = dist.shape
    scores = dist * w_ref[...]                                 # (B, P) * (1, P)

    col = jax.lax.broadcasted_iota(jnp.int32, (b_dim, p_dim), 1)
    sel_col = jax.lax.broadcasted_iota(jnp.int32, (b_dim, num_sel), 1)

    sel_out = jnp.zeros((b_dim, num_sel), jnp.int32)
    loss_rows = jnp.zeros((b_dim, 1), jnp.float32)
    counts = jnp.zeros((1, p_dim), jnp.float32)
    work = scores
    for kk in range(num_sel):                                  # static, unrolled (num_sel tiny)
        mn = jnp.min(work, axis=1, keepdims=True)              # (B, 1)
        # smallest index among ties -> matches torch.topk / lax.top_k tie-breaking
        idx = jnp.min(jnp.where(work == mn, col, p_dim), axis=1, keepdims=True)  # (B, 1) int32
        onehot = (col == idx).astype(jnp.float32)              # (B, P)
        sel_out = jnp.where(sel_col == kk, idx, sel_out)
        loss_rows = loss_rows + jnp.sum(dist * onehot, axis=1, keepdims=True)
        counts = counts + jnp.sum(onehot, axis=0, keepdims=True)
        work = jnp.where(col == idx, jnp.inf, work)            # mask out selected entry

    sel_ref[...] = sel_out
    cnt_ref[...] = counts
    loss_ref[...] = jnp.sum(loss_rows, axis=0, keepdims=True) * (1.0 / b_dim)


def lp_select(video_emb, keys, weights, num_sel):
    B, D = video_emb.shape
    P, _ = keys.shape
    w2 = weights.reshape(1, P).astype(jnp.float32)
    return pl.pallas_call(
        functools.partial(_select_kernel, num_sel=num_sel),
        grid=(1,),
        out_shape=(
            jax.ShapeDtypeStruct((B, P), jnp.float32),        # distances (output_sel)
            jax.ShapeDtypeStruct((B, num_sel), jnp.int32),    # selected prompt ids
            jax.ShapeDtypeStruct((1, P), jnp.float32),        # freq_acc increments
            jax.ShapeDtypeStruct((1, 1), jnp.float32),        # val_sim_loss
        ),
        in_specs=[
            pl.BlockSpec((B, D), lambda i: (0, 0)),
            pl.BlockSpec((P, D), lambda i: (0, 0)),
            pl.BlockSpec((1, P), lambda i: (0, 0)),
        ],
        out_specs=(
            pl.BlockSpec((B, P), lambda i: (0, 0)),
            pl.BlockSpec((B, num_sel), lambda i: (0, 0)),
            pl.BlockSpec((1, P), lambda i: (0, 0)),
            pl.BlockSpec((1, 1), lambda i: (0, 0)),
        ),
    )(video_emb, keys, w2)


# ----------------------------------------------------------------------------
# Kernel 2 (fused gather + prepend, ViT path), lane-dense token layout.
#   sel_index : (B, k) int32  -- scalar-prefetch (SMEM)
#   p_flat    : (num_prompts, L_sp_tk*W)   -- whole table resident in VMEM
#   x_flat    : (B, S, N*W)
#   out       : (B, S, (k*L_sp_tk + N)*W)
# grid=(B,): one whole (segments x tokens) block per batch element; prompt table and the
# output/x blocks are large, so per-step overhead is amortized; direct slice stores, no concat.
# ----------------------------------------------------------------------------
def _lp_prepend_kernel(sel_ref, p_ref, x_ref, o_ref, *, num_sel, l_tok_w, lp_w):
    b = pl.program_id(0)
    S = x_ref.shape[1]
    # original tokens go after the prompt region (single direct slice store)
    o_ref[0, :, lp_w:] = x_ref[0]
    # gather the selected prompts straight out of the resident table (no XLA gather)
    for kk in range(num_sel):                                  # static, unrolled
        row = p_ref[pl.ds(sel_ref[b, kk], 1), :]               # (1, L_sp_tk*W) dynamic row
        o_ref[0, :, kk * l_tok_w:(kk + 1) * l_tok_w] = (
            jnp.broadcast_to(row, (S, l_tok_w)).astype(o_ref.dtype))


def lp_prepend(sel_index, p_vit, x, *, num_segments, vmem_limit_bytes=None):
    B_total, N, W = x.shape
    B = B_total // num_segments
    P_num, L, _ = p_vit.shape
    num_sel = sel_index.shape[1]
    Lp = num_sel * L

    # lane-dense presentation: flatten token x width into the lane axis (free, contiguous)
    x_flat = x.reshape(B, num_segments, N * W)
    p_flat = p_vit.reshape(P_num, L * W)

    compiler_params = pltpu.CompilerParams(
        dimension_semantics=("parallel",),
        # TODO(synk): at production ViT sizes on v7x (64 MiB VMEM), split the segment axis
        # into 2 blocks or raise vmem_limit_bytes explicitly; the per-batch block here is tiny.
        vmem_limit_bytes=vmem_limit_bytes,
    )

    out = pl.pallas_call(
        functools.partial(_lp_prepend_kernel, num_sel=num_sel,
                          l_tok_w=L * W, lp_w=Lp * W),
        grid_spec=pltpu.PrefetchScalarGridSpec(
            num_scalar_prefetch=1,
            grid=(B,),
            in_specs=[
                # whole prompt table, constant block index -> DMA'd once, stays resident
                pl.BlockSpec((P_num, L * W), lambda b, sel: (0, 0)),
                pl.BlockSpec((1, num_segments, N * W), lambda b, sel: (b, 0, 0)),
            ],
            out_specs=pl.BlockSpec((1, num_segments, (Lp + N) * W),
                                   lambda b, sel: (b, 0, 0)),
        ),
        out_shape=jax.ShapeDtypeStruct((B, num_segments, (Lp + N) * W), x.dtype),
        compiler_params=compiler_params,
    )(sel_index.astype(jnp.int32), p_flat, x_flat)

    return out.reshape(B * num_segments, Lp + N, W)


# ----------------------------------------------------------------------------
# Kernel 3: 'general' prompt branch — expand P_gn over batch and prepend on the seq dim.
# Lane-dense 2-D layout, direct slice stores, single grid step (whole thing fits VMEM here).
# ----------------------------------------------------------------------------
def _general_prepend_kernel(p_ref, x_ref, o_ref, *, l_w):
    B = x_ref.shape[0]
    o_ref[:, l_w:] = x_ref[...]
    o_ref[:, :l_w] = jnp.broadcast_to(p_ref[...], (B, l_w)).astype(o_ref.dtype)


def general_prepend(p_gn, x):
    B, S, W = x.shape
    L = p_gn.shape[0]
    x_flat = x.reshape(B, S * W)
    p_flat = p_gn.reshape(1, L * W)
    # TODO(synk): for large batch, tile the batch axis in multiples of 8 rows instead of (1,).
    out = pl.pallas_call(
        functools.partial(_general_prepend_kernel, l_w=L * W),
        grid=(1,),
        out_shape=jax.ShapeDtypeStruct((B, (L + S) * W), x.dtype),
        in_specs=[
            pl.BlockSpec((1, L * W), lambda i: (0, 0)),
            pl.BlockSpec((B, S * W), lambda i: (0, 0)),
        ],
        out_specs=pl.BlockSpec((B, (L + S) * W), lambda i: (0, 0)),
    )(p_flat, x_flat)
    return out.reshape(B, L + S, W)


# ----------------------------------------------------------------------------
# PromptModule (JAX/Pallas). Parameters are created deterministically in-script.
# NOTE: freq_acc / val_sim_loss are kept as Python-side functional state (same values as the
# PyTorch module after one forward); under jit/grad this state handling would need threading.
# ----------------------------------------------------------------------------
class PromptModule:
    def __init__(self, key, *, num_prompts, num_sel_prompts, L_sp_tk,
                 vid_width, temp_width, num_segments, L_sp_gn):
        self.num_prompts = num_prompts
        self.num_sel_prompts = num_sel_prompts
        self.L_sp_tk = L_sp_tk
        self.vid_width = vid_width
        self.temp_width = temp_width
        self.num_segments = num_segments

        k1, k2, k3 = jax.random.split(key, 3)
        # learning_to_prompt parameters: P_ViT_j (Embedding(L_sp_tk, vid_width)),
        # K_ViT_j (Embedding(1, temp_width)), init normal std=0.02, stacked over j.
        self.P_ViT = 0.02 * jax.random.normal(k1, (num_prompts, L_sp_tk, vid_width),
                                              dtype=jnp.float32)
        self.K_ViT = 0.02 * jax.random.normal(k2, (num_prompts, temp_width),
                                              dtype=jnp.float32)
        # 'general' parameters: P_gn_ViT (Embedding(L_sp_gn, vid_width))
        self.P_gn_ViT = 0.02 * jax.random.normal(k3, (L_sp_gn, vid_width),
                                                 dtype=jnp.float32)

        self.frequency = jnp.zeros((num_prompts,), jnp.float32)
        self.freq_acc = jnp.zeros((num_prompts,), jnp.float32)
        self.val_sim_loss = jnp.zeros((1,), jnp.float32)

        self.video_emb_wo_prompt = None
        self.is_train = True
        self._last_output_sel = None
        self._last_sel_index = None

    def set_video_emb_wo_prompt(self, video_emb_wo_prompt, is_train):
        self.video_emb_wo_prompt = video_emb_wo_prompt
        self.is_train = bool(is_train)          # static Python flag (jit-safe branching)

    # ---- learning_to_prompt forward (source == 'ViT') ----
    def forward_lp_vit(self, x):
        B_total, N, W = x.shape
        B = B_total // self.num_segments

        # branch-free frequency regularization (jit-safe, no bool() on traced arrays):
        # when frequency is all-zero or not training, weights == 1 -> plain top-k of distances.
        freq_sum = jnp.sum(self.frequency)
        if self.is_train:
            use_freq = freq_sum != 0
            safe_sum = jnp.where(freq_sum == 0, 1.0, freq_sum)
            weights = jnp.where(use_freq, self.frequency / safe_sum,
                                jnp.ones_like(self.frequency))
        else:
            weights = jnp.ones_like(self.frequency)

        # fused distance + selection + counts + loss kernel
        output_sel, sel_index, counts, loss = lp_select(
            self.video_emb_wo_prompt, self.K_ViT, weights, self.num_sel_prompts)

        self._last_output_sel = output_sel
        self._last_sel_index = sel_index
        self.freq_acc = self.freq_acc + counts.reshape(-1)
        self.val_sim_loss = loss.reshape(1)

        # fused gather + prepend kernel (scalar-prefetch indices, lane-dense output)
        out = lp_prepend(sel_index, self.P_ViT, x, num_segments=self.num_segments)
        return out

    # ---- 'general' forward ----
    def forward_general(self, x, source='ViT'):
        B, S, W = x.shape
        out = general_prepend(self.P_gn_ViT, x)                 # (B, L+S, W)
        if source == 'txt':
            out = out[:, :S, :]   # text modulation: keep original sequence length
        return out

    # TODO(synk): TIL/CIL task-selector branches depend on Python dict/string lookups
    # (cls_to_task_id, text_description) and per-task nn.Embedding registration / requires_grad
    # toggling; the per-element prompt-prepend itself reuses the same lp_prepend kernel.


# ----------------------------------------------------------------------------
if __name__ == "__main__":
    key = jax.random.PRNGKey(0)

    # small synthetic config consistent with the module
    batch = 2
    num_segments = 4
    num_tokens = 8
    vid_width = 32
    temp_width = 32
    num_prompts = 8
    num_sel_prompts = 2
    L_sp_tk = 4
    L_sp_gn = 4

    k_mod, k_x, k_v, k_g = jax.random.split(key, 4)
    module = PromptModule(k_mod,
                          num_prompts=num_prompts, num_sel_prompts=num_sel_prompts,
                          L_sp_tk=L_sp_tk, vid_width=vid_width, temp_width=temp_width,
                          num_segments=num_segments, L_sp_gn=L_sp_gn)

    # inputs
    x_vit = jax.random.normal(k_x, (batch * num_segments, num_tokens, vid_width),
                              dtype=jnp.float32)
    video_emb = jax.random.normal(k_v, (batch, temp_width), dtype=jnp.float32)
    x_gen = jax.random.normal(k_g, (batch, num_tokens, vid_width), dtype=jnp.float32)

    # --- learning_to_prompt path ---
    module.set_video_emb_wo_prompt(video_emb, is_train=True)
    out_lp = jax.block_until_ready(module.forward_lp_vit(x_vit))
    assert out_lp.shape == (batch * num_segments,
                            num_sel_prompts * L_sp_tk + num_tokens, vid_width)

    # reference check: cosine distances
    v_n = video_emb / jnp.maximum(
        jnp.linalg.norm(video_emb, axis=-1, keepdims=True), 1e-12)
    k_n = module.K_ViT / jnp.maximum(
        jnp.linalg.norm(module.K_ViT, axis=-1, keepdims=True), 1e-12)
    ref_dist = 1.0 - v_n @ k_n.T
    assert jnp.allclose(module._last_output_sel, ref_dist, atol=1e-5), "distance mismatch"

    # reference check: selection indices (k smallest distances)
    _, ref_sel = jax.lax.top_k(-module._last_output_sel, num_sel_prompts)
    assert jnp.array_equal(module._last_sel_index, ref_sel.astype(jnp.int32)), "top-k mismatch"

    # reference check: fused gather + prepend
    sel_idx = module._last_sel_index
    p_flat = module.P_ViT[sel_idx].reshape(batch, num_sel_prompts * L_sp_tk, vid_width)
    x4 = x_vit.reshape(batch, num_segments, num_tokens, vid_width)
    ref_out = jnp.concatenate(
        [jnp.broadcast_to(p_flat[:, None], (batch, num_segments) + p_flat.shape[1:]), x4],
        axis=2).reshape(out_lp.shape)
    assert jnp.allclose(out_lp, ref_out), "prepend kernel mismatch"

    # reference check: freq_acc counts and similarity loss
    ref_counts = jnp.zeros((num_prompts,), jnp.float32).at[sel_idx.reshape(-1)].add(1.0)
    assert jnp.allclose(module.freq_acc, ref_counts), "freq_acc mismatch"
    ref_loss = jnp.mean(jnp.sum(
        jnp.take_along_axis(module._last_output_sel, sel_idx, axis=1), axis=1))
    assert jnp.allclose(module.val_sim_loss, ref_loss, atol=1e-6), "sim loss mismatch"

    # --- 'general' path ---
    out_gen = jax.block_until_ready(module.forward_general(x_gen, source='ViT'))
    assert out_gen.shape == (batch, L_sp_gn + num_tokens, vid_width)
    ref_gen = jnp.concatenate(
        [jnp.broadcast_to(module.P_gn_ViT[None], (batch, L_sp_gn, vid_width)), x_gen], axis=1)
    assert jnp.allclose(out_gen, ref_gen), "general kernel mismatch"

    jax.block_until_ready(module.val_sim_loss)
    print("KERNEL_OK")
</pallas_src>

<mosaic_0001>
module attributes {stable_mosaic.version = 11 : i64} {
  func.func @_select_kernel(%arg0: i32, %arg1: memref<2x32xf32, #tpu.memory_space<vmem>>, %arg2: memref<8x32xf32, #tpu.memory_space<vmem>>, %arg3: memref<1x8xf32, #tpu.memory_space<vmem>>, %arg4: memref<2x8xf32, #tpu.memory_space<vmem>>, %arg5: memref<2x2xi32, #tpu.memory_space<vmem>>, %arg6: memref<1x8xf32, #tpu.memory_space<vmem>>, %arg7: memref<1x1xf32, #tpu.memory_space<vmem>>) attributes {dimension_semantics = [#tpu.dimension_semantics<arbitrary>], iteration_bounds = array<i64: 1>, scalar_prefetch = 0 : i64, scratch_operands = 0 : i64, tpu.core_type = #tpu.core_type<tc>, window_params = [{pipeline_mode = #tpu.pipeline_mode<synchronous>, transform_indices = @transform_0, window_bounds = array<i64: 2, 32>}, {pipeline_mode = #tpu.pipeline_mode<synchronous>, transform_indices = @transform_1, window_bounds = array<i64: 8, 32>}, {pipeline_mode = #tpu.pipeline_mode<synchronous>, transform_indices = @transform_2, window_bounds = array<i64: 1, 8>}, {pipeline_mode = #tpu.pipeline_mode<synchronous>, transform_indices = @transform_3, window_bounds = array<i64: 2, 8>}, {pipeline_mode = #tpu.pipeline_mode<synchronous>, transform_indices = @transform_4, window_bounds = array<i64: 2, 2>}, {pipeline_mode = #tpu.pipeline_mode<synchronous>, transform_indices = @transform_5, window_bounds = array<i64: 1, 8>}, {pipeline_mode = #tpu.pipeline_mode<synchronous>, transform_indices = @transform_6, window_bounds = array<i64: 1, 1>}]} {
    %c0 = arith.constant 0 : index
    %c0_0 = arith.constant 0 : index
    %0 = vector.load %arg1[%c0, %c0_0] : memref<2x32xf32, #tpu.memory_space<vmem>>, vector<2x32xf32>
    %c0_1 = arith.constant 0 : index
    %c0_2 = arith.constant 0 : index
    %1 = vector.load %arg2[%c0_1, %c0_2] : memref<8x32xf32, #tpu.memory_space<vmem>>, vector<8x32xf32>
    %2 = arith.mulf %0, %0 : vector<2x32xf32>
    %cst = arith.constant dense<0.000000e+00> : vector<2xf32>
    %3 = vector.multi_reduction <add>, %2, %cst [1] : vector<2x32xf32> to vector<2xf32>
    %4 = vector.shape_cast %3 : vector<2xf32> to vector<2x1xf32>
    %cst_3 = arith.constant 1.000000e-24 : f32
    %5 = vector.broadcast %cst_3 : f32 to vector<2x1xf32>
    %6 = arith.maximumf %4, %5 : vector<2x1xf32>
    %7 = math.rsqrt %6 : vector<2x1xf32>
    %8 = vector.broadcast %7 : vector<2x1xf32> to vector<2x32xf32>
    %9 = arith.mulf %0, %8 : vector<2x32xf32>
    %10 = arith.mulf %1, %1 : vector<8x32xf32>
    %cst_4 = arith.constant dense<0.000000e+00> : vector<8xf32>
    %11 = vector.multi_reduction <add>, %10, %cst_4 [1] : vector<8x32xf32> to vector<8xf32>
    %12 = vector.shape_cast %11 : vector<8xf32> to vector<8x1xf32>
    %cst_5 = arith.constant 1.000000e-24 : f32
    %13 = vector.broadcast %cst_5 : f32 to vector<8x1xf32>
    %14 = arith.maximumf %12, %13 : vector<8x1xf32>
    %15 = math.rsqrt %14 : vector<8x1xf32>
    %16 = vector.broadcast %15 : vector<8x1xf32> to vector<8x32xf32>
    %17 = arith.mulf %1, %16 : vector<8x32xf32>
    %18 = tpu.transpose %17, [1, 0] : vector<8x32xf32> -> vector<32x8xf32>
    %cst_6 = arith.constant dense<0.000000e+00> : vector<2x8xf32>
    %19 = tpu.matmul %9, %18, %cst_6 {dimension_numbers = #tpu.dot_dimension_numbers<[1], [0], [0], [1], [0, 0, 1, 1], [], []>} : vector<2x32xf32>, vector<32x8xf32>, vector<2x8xf32> -> vector<2x8xf32>
    %cst_7 = arith.constant 1.000000e+00 : f32
    %20 = vector.broadcast %cst_7 : f32 to vector<2x8xf32>
    %21 = arith.subf %20, %19 : vector<2x8xf32>
    %c0_8 = arith.constant 0 : index
    %c0_9 = arith.constant 0 : index
    %22 = vector.load %arg4[%c0_8, %c0_9] : memref<2x8xf32, #tpu.memory_space<vmem>>, vector<2x8xf32>
    tpu.vector_store %arg4[%c0_8, %c0_9], %21 {strides = array<i32>} : memref<2x8xf32, #tpu.memory_space<vmem>>, vector<2x8xf32>,
    %c0_10 = arith.constant 0 : index
    %c0_11 = arith.constant 0 : index
    %23 = vector.load %arg3[%c0_10, %c0_11] : memref<1x8xf32, #tpu.memory_space<vmem>>, vector<1x8xf32>
    %24 = vector.broadcast %23 : vector<1x8xf32> to vector<2x8xf32>
    %25 = arith.mulf %21, %24 : vector<2x8xf32>
    %26 = tpu.iota {dimensions = array<i32: 1>} : vector<2x8xi32>
    %27 = tpu.iota {dimensions = array<i32: 1>} : vector<2x2xi32>
    %c0_i32 = arith.constant 0 : i32
    %28 = vector.broadcast %c0_i32 : i32 to vector<2x2xi32>
    %cst_12 = arith.constant 0.000000e+00 : f32
    %29 = vector.broadcast %cst_12 : f32 to vector<2x1xf32>
    %cst_13 = arith.constant 0.000000e+00 : f32
    %30 = vector.broadcast %cst_13 : f32 to vector<1x8xf32>
    %cst_14 = arith.constant dense<0x7F800000> : vector<2xf32>
    %31 = vector.multi_reduction <minimumf>, %25, %cst_14 [1] : vector<2x8xf32> to vector<2xf32>
    %32 = vector.shape_cast %31 : vector<2xf32> to vector<2x1xf32>
    %33 = vector.broadcast %32 : vector<2x1xf32> to vector<2x8xf32>
    %34 = arith.cmpf oeq, %25, %33 : vector<2x8xf32>
    %c8_i32 = arith.constant 8 : i32
    %35 = vector.broadcast %c8_i32 : i32 to vector<2x8xi32>
    %36 = arith.select %34, %26, %35 : vector<2x8xi1>, vector<2x8xi32>
    %cst_15 = arith.constant dense<2147483647> : vector<2xi32>
    %37 = vector.multi_reduction <minsi>, %36, %cst_15 [1] : vector<2x8xi32> to vector<2xi32>
    %38 = vector.shape_cast %37 : vector<2xi32> to vector<2x1xi32>
    %39 = vector.broadcast %38 : vector<2x1xi32> to vector<2x8xi32>
    %40 = arith.cmpi eq, %26, %39 : vector<2x8xi32>
    %41 = arith.extui %40 : vector<2x8xi1> to vector<2x8xi32>
    %42 = arith.sitofp %41 : vector<2x8xi32> to vector<2x8xf32>
    %c0_i32_16 = arith.constant 0 : i32
    %43 = vector.broadcast %c0_i32_16 : i32 to vector<2x2xi32>
    %44 = arith.cmpi eq, %27, %43 : vector<2x2xi32>
    %45 = vector.shape_cast %38 : vector<2x1xi32> to vector<2x1xi32>
    %46 = vector.broadcast %45 : vector<2x1xi32> to vector<2x2xi32>
    %47 = arith.select %44, %46, %28 : vector<2x2xi1>, vector<2x2xi32>
    %48 = arith.mulf %21, %42 : vector<2x8xf32>
    %cst_17 = arith.constant dense<0.000000e+00> : vector<2xf32>
    %49 = vector.multi_reduction <add>, %48, %cst_17 [1] : vector<2x8xf32> to vector<2xf32>
    %50 = vector.shape_cast %49 : vector<2xf32> to vector<2x1xf32>
    %51 = arith.addf %29, %50 : vector<2x1xf32>
    %cst_18 = arith.constant dense<0.000000e+00> : vector<8xf32>
    %52 = vector.multi_reduction <add>, %42, %cst_18 [0] : vector<2x8xf32> to vector<8xf32>
    %53 = vector.shape_cast %52 : vector<8xf32> to vector<1x8xf32>
    %54 = arith.addf %30, %53 : vector<1x8xf32>
    %55 = vector.broadcast %38 : vector<2x1xi32> to vector<2x8xi32>
    %56 = arith.cmpi eq, %26, %55 : vector<2x8xi32>
    %cst_19 = arith.constant 0x7F800000 : f32
    %57 = vector.broadcast %cst_19 : f32 to vector<2x8xf32>
    %58 = arith.select %56, %57, %25 : vector<2x8xi1>, vector<2x8xf32>
    %cst_20 = arith.constant dense<0x7F800000> : vector<2xf32>
    %59 = vector.multi_reduction <minimumf>, %58, %cst_20 [1] : vector<2x8xf32> to vector<2xf32>
    %60 = vector.shape_cast %59 : vector<2xf32> to vector<2x1xf32>
    %61 = vector.broadcast %60 : vector<2x1xf32> to vector<2x8xf32>
    %62 = arith.cmpf oeq, %58, %61 : vector<2x8xf32>
    %c8_i32_21 = arith.constant 8 : i32
    %63 = vector.broadcast %c8_i32_21 : i32 to vector<2x8xi32>
    %64 = arith.select %62, %26, %63 : vector<2x8xi1>, vector<2x8xi32>
    %cst_22 = arith.constant dense<2147483647> : vector<2xi32>
    %65 = vector.multi_reduction <minsi>, %64, %cst_22 [1] : vector<2x8xi32> to vector<2xi32>
    %66 = vector.shape_cast %65 : vector<2xi32> to vector<2x1xi32>
    %67 = vector.broadcast %66 : vector<2x1xi32> to vector<2x8xi32>
    %68 = arith.cmpi eq, %26, %67 : vector<2x8xi32>
    %69 = arith.extui %68 : vector<2x8xi1> to vector<2x8xi32>
    %70 = arith.sitofp %69 : vector<2x8xi32> to vector<2x8xf32>
    %c1_i32 = arith.constant 1 : i32
    %71 = vector.broadcast %c1_i32 : i32 to vector<2x2xi32>
    %72 = arith.cmpi eq, %27, %71 : vector<2x2xi32>
    %73 = vector.shape_cast %66 : vector<2x1xi32> to vector<2x1xi32>
    %74 = vector.broadcast %73 : vector<2x1xi32> to vector<2x2xi32>
    %75 = arith.select %72, %74, %47 : vector<2x2xi1>, vector<2x2xi32>
    %76 = arith.mulf %21, %70 : vector<2x8xf32>
    %cst_23 = arith.constant dense<0.000000e+00> : vector<2xf32>
    %77 = vector.multi_reduction <add>, %76, %cst_23 [1] : vector<2x8xf32> to vector<2xf32>
    %78 = vector.shape_cast %77 : vector<2xf32> to vector<2x1xf32>
    %79 = arith.addf %51, %78 : vector<2x1xf32>
    %cst_24 = arith.constant dense<0.000000e+00> : vector<8xf32>
    %80 = vector.multi_reduction <add>, %70, %cst_24 [0] : vector<2x8xf32> to vector<8xf32>
    %81 = vector.shape_cast %80 : vector<8xf32> to vector<1x8xf32>
    %82 = arith.addf %54, %81 : vector<1x8xf32>
    %c0_25 = arith.constant 0 : index
    %c0_26 = arith.constant 0 : index
    %83 = vector.load %arg5[%c0_25, %c0_26] : memref<2x2xi32, #tpu.memory_space<vmem>>, vector<2x2xi32>
    tpu.vector_store %arg5[%c0_25, %c0_26], %75 {strides = array<i32>} : memref<2x2xi32, #tpu.memory_space<vmem>>, vector<2x2xi32>,
    %c0_27 = arith.constant 0 : index
    %c0_28 = arith.constant 0 : index
    %84 = vector.load %arg6[%c0_27, %c0_28] : memref<1x8xf32, #tpu.memory_space<vmem>>, vector<1x8xf32>
    tpu.vector_store %arg6[%c0_27, %c0_28], %82 {strides = array<i32>} : memref<1x8xf32, #tpu.memory_space<vmem>>, vector<1x8xf32>,
    %cst_29 = arith.constant dense<0.000000e+00> : vector<1xf32>
    %85 = vector.multi_reduction <add>, %79, %cst_29 [0] : vector<2x1xf32> to vector<1xf32>
    %86 = vector.shape_cast %85 : vector<1xf32> to vector<1x1xf32>
    %cst_30 = arith.constant 5.000000e-01 : f32
    %87 = vector.broadcast %cst_30 : f32 to vector<1x1xf32>
    %88 = arith.mulf %86, %87 : vector<1x1xf32>
    %c0_31 = arith.constant 0 : index
    %c0_32 = arith.constant 0 : index
    %89 = vector.load %arg7[%c0_31, %c0_32] : memref<1x1xf32, #tpu.memory_space<vmem>>, vector<1x1xf32>
    tpu.vector_store %arg7[%c0_31, %c0_32], %88 {strides = array<i32>} : memref<1x1xf32, #tpu.memory_space<vmem>>, vector<1x1xf32>,
    return
  }
  func.func @transform_0(%arg0: i32) -> (i32, i32) {
    %c0_i32 = arith.constant 0 : i32
    %c0_i32_0 = arith.constant 0 : i32
    %c0_i32_1 = arith.constant 0 : i32
    return %c0_i32, %c0_i32_0 : i32, i32
  }
  func.func @transform_1(%arg0: i32) -> (i32, i32) {
    %c0_i32 = arith.constant 0 : i32
    %c0_i32_0 = arith.constant 0 : i32
    %c0_i32_1 = arith.constant 0 : i32
    return %c0_i32, %c0_i32_0 : i32, i32
  }
  func.func @transform_2(%arg0: i32) -> (i32, i32) {
    %c0_i32 = arith.constant 0 : i32
    %c0_i32_0 = arith.constant 0 : i32
    %c0_i32_1 = arith.constant 0 : i32
    return %c0_i32, %c0_i32_0 : i32, i32
  }
  func.func @transform_3(%arg0: i32) -> (i32, i32) {
    %c0_i32 = arith.constant 0 : i32
    %c0_i32_0 = arith.constant 0 : i32
    %c0_i32_1 = arith.constant 0 : i32
    return %c0_i32, %c0_i32_0 : i32, i32
  }
  func.func @transform_4(%arg0: i32) -> (i32, i32) {
    %c0_i32 = arith.constant 0 : i32
    %c0_i32_0 = arith.constant 0 : i32
    %c0_i32_1 = arith.constant 0 : i32
    return %c0_i32, %c0_i32_0 : i32, i32
  }
  func.func @transform_5(%arg0: i32) -> (i32, i32) {
    %c0_i32 = arith.constant 0 : i32
    %c0_i32_0 = arith.constant 0 : i32
    %c0_i32_1 = arith.constant 0 : i32
    return %c0_i32, %c0_i32_0 : i32, i32
  }
  func.func @transform_6(%arg0: i32) -> (i32, i32) {
    %c0_i32 = arith.constant 0 : i32
    %c0_i32_0 = arith.constant 0 : i32
    %c0_i32_1 = arith.constant 0 : i32
    return %c0_i32, %c0_i32_0 : i32, i32
  }
}

</mosaic_0001>

<bundles_post_ra>
// kernel: tpu_custom_call.1
= control target key start
LH: loop header
LB: loop body
LE: loop exit
PB: predicated region body
PF: predicated region fallthrough
CT: control target
= control target key end

     0   :  { %12 = vsyncpa [#allocation3], 0  ;;  %s541_s0 = inlined_call_operand.hbm [shape: f32[2,32], index: 0, kind: input, shape index: {}]   ;;  %s542_s1 = inlined_call_operand.hbm [shape: f32[8,32], index: 1, kind: input, shape index: {}]   ;;  %s543_s2 = inlined_call_operand.vmem [shape: f32[1,8], index: 2, kind: input, shape index: {}]   ;;  %s544_s3 = inlined_call_operand.hbm [shape: f32[2,8], index: 3, kind: output, shape index: {0}]   ;;  %s545_s4 = inlined_call_operand.hbm [shape: s32[2,2], index: 4, kind: output, shape index: {1}]   ;;  %s546_s5 = inlined_call_operand.hbm [shape: f32[1,8], index: 5, kind: output, shape index: {2}]   ;;  %s547_s6 = inlined_call_operand.hbm [shape: f32[1,1], index: 6, kind: output, shape index: {3}]  }
   0x1   :  { %13 = vsyncpa [#allocation6], 0 }
   0x2   :  { %14 = vsyncpa [#allocation4], 0 }
   0x3   :  { %15 = vsyncpa [#allocation9], 0 }
   0x4   :  { %16 = vsyncpa [#allocation12], 0  ;;  %s455_s21 = smov [#allocation2]   ;;  %s456_s23 = smov [#allocation5]  }
   0x5   :  { %s23_s22 = sshll.u32 %s455_s21, 4  ;;  %s33_s24 = sshll.u32 %s456_s23, 4  ;;  %s24_s22 = int_to_ptr.vmem [resolvable:$true] %s23_s22  ;;  %s34_s24 = int_to_ptr.vmem [resolvable:$true] %s33_s24 }
   0x6   :  { %s333_s25 = scalar_lea.vmem %s24_s22, 32  ;;  %p338_p1 = scmp.lt.s32.totalorder %s24_s22, %s24_s22 }
   0x7   :  { %p334_p0 = scmp.ne.s32.totalorder %s24_s22, %s333_s25  ;;  %p339_p2 = scmp.lt.s32.totalorder %s333_s25, %s333_s25 }
   0x9   :  { %p340_p3 = por %p339_p2, %p338_p1 }
   0xb   :  { %p341_p4 = pnand %p340_p3, %p334_p0 }
   0xd   :  { %344 = shalt.err (!%p341_p4)
}
   0xe   :  { %26 = dma.hbm_to_vmem [thread:$0]  %s541_s0, 32, %s24_s22, [#allocation3]  }
   0xf   :  { %s353_s28 = scalar_lea.vmem %s34_s24, 128  ;;  %p358_p6 = scmp.lt.s32.totalorder %s34_s24, %s34_s24 }
  0x10   :  { %p354_p5 = scmp.ne.s32.totalorder %s34_s24, %s353_s28  ;;  %p359_p7 = scmp.lt.s32.totalorder %s353_s28, %s353_s28 }
  0x12   :  { %p360_p8 = por %p359_p7, %p358_p6 }
  0x14   :  { %p361_p9 = pnand %p360_p8, %p354_p5 }
  0x16   :  { %364 = shalt.err (!%p361_p9)
}
  0x17   :  { %36 = dma.hbm_to_vmem [thread:$0]  %s542_s1, 128, %s34_s24, [#allocation6]  }
  0x18   :  { %445 = dma.done.wait [#allocation3], 32  }
  0x19   :  { %446 = vsyncadd [#allocation3], 4294967264 }
  0x1a   :  { %447 = dma.done.wait [#allocation6], 128  }
  0x1b   :  { %448 = vsyncadd [#allocation6], 4294967168  ;;  %v46_v0 = vld [vmem:[#allocation5] sm:$0xff]  ;;  %vm56_vm0 = vcmask 261120   ;;  %v45_v1 = vld [vmem:[#allocation2] sm:$0x3]  ;;  %v150_v21 = vlaneseq }
  0x1c   :  { %v55_v2 = vmul.f32 %v46_v0, %v46_v0  ;;  %v47_v3 = vmul.f32 %v45_v1, %v45_v1  ;;  %vm48_vm1 = vcmask 254976   ;;  %v457_v6 = vmov 0.0   ;;  %v303_v16 = vld [vmem:[%s543_s2] ss:$0 sm:$0xff]  ;;  %s459_s2 = smov [#allocation8]   ;;  %s460_s8 = smov [#allocation7]  }
  0x1d   :  { %308 = vmatprep.subr.mxu0 %v457_v6  ;;  %vm458_vm2 = vmmov 0   ;;  %vm140_vm3 = vcmask 58368   ;;  %v151_v22 = vand.u32 127, %v150_v21  ;;  %vm229_vm11 = vcmask 9216   ;;  %s260_s7 = sshll.u32 %s459_s2, 4  ;;  %s250_s9 = sshll.u32 %s460_s8, 4  ;;  %s261_s7 = int_to_ptr.vmem [resolvable:$true] %s260_s7  ;;  %s251_s9 = int_to_ptr.vmem [resolvable:$true] %s250_s9 }
  0x1e   :  { %v57_v4 = vsel %vm56_vm0, %v55_v2, 0.0  ;;  %v49_v5 = vsel %vm48_vm1, %v47_v3, 0.0  ;;  %310 = vmatprep.mubr.msk.f32.mxu0 %vm458_vm2, %v457_v6  ;;  %vm231_vm13 = vcmask 57344   ;;  %s365_s10 = scalar_lea.vmem %s261_s7, 32  ;;  %p370_p11 = scmp.lt.s32.totalorder %s261_s7, %s261_s7 }
  0x1f   :  { %58 = vadd.xlane.f32.xlu0 %v57_v4  ;;  %vm175_vm9 = vcmp.eq.s32.totalorder %v151_v22, 0  ;;  %vm214_vm10 = vcmp.eq.s32.totalorder %v151_v22, 1  ;;  %p366_p10 = scmp.ne.s32.totalorder %s261_s7, %s365_s10  ;;  %p371_p12 = scmp.lt.s32.totalorder %s365_s10, %s365_s10 }
  0x21   :  { %p372_p13 = por %p371_p12, %p370_p11 }
  0x23   :  { %50 = vadd.xlane.f32.xlu0 %v49_v5  ;;  %p373_p0 = pnand %p372_p13, %p366_p10 }
  0xa8   :  { %v59_v7 = vpop.xlane.xlu0 %58 }
  0xa9   :  { %v60_v8 = vmax.f32 %v59_v7, 1e-24 }
  0xab   :  { %321 = vrsqrt.f32 %v60_v8 }
  0xac   :  { %v51_v9 = vpop.xlane.xlu0 %50 }
  0xad   :  { %v52_v10 = vmax.f32 %v51_v9, 1e-24 }
  0xaf   :  { %323 = vrsqrt.f32 %v52_v10 }
  0xb8   :  { %v322_v11 = vpop.eup %321 }
  0xb9   :  { %v62_v12 = vmul.f32 %v322_v11, %v46_v0 }
  0xbb   :  { %309 = vmatpush3.xpose.msk.msra.mxu0 %vm56_vm0, %v62_v12 }
  0xbc   :  { %v324_v13 = vpop.eup %323 }
  0xbd   :  { %v54_v14 = vmul.f32 %v324_v13, %v45_v1 }
  0xbf   :  { %311 = vmatmul.mubr.msk.f32.vlgmr.msra.gmra.mxu0 %vm56_vm0, %v54_v14 }
 0x17f   :  { %v135_v15 = vpop.f32.mrf.mxu0 }
 0x180   :  { %v512_v17 = vsub.f32 1.0, %v135_v15 }
 0x181   :  { %v312_v18 = vpop.f32.mrf.mxu0 }
 0x182   :  { %v149_v19 = vmul.f32 %v303_v16, %v512_v17  ;;  %141 = vst.msk [vmem:[#allocation7] sm:$0x3] %vm140_vm3, %v512_v17 }
 0x184   :  { %v152_v20 = vsel %vm140_vm3, %v149_v19, inf }
 0x185   :  { %153 = vmin.xlane.f32.xlu1 %v152_v20 }
 0x20e   :  { %v154_v23 = vpop.xlane.xlu1 %153 }
 0x20f   :  { %vm155_vm4 = vcmp.eq.f32.partialorder %v149_v19, %v154_v23 }
 0x210   :  { %v156_v24 = vsel %vm155_vm4, %v151_v22, 8 }
 0x211   :  { %v157_v25 = vsel %vm140_vm3, %v156_v24, 2147483647 }
 0x212   :  { %v159_v26 = vshra.s32 %v157_v25, 16  ;;  %v158_v28 = vand.u32 65535, %v157_v25 }
 0x214   :  { %v161_v27 = vcvt.s32.f32 %v159_v26  ;;  %v160_v30 = vcvt.s32.f32 %v158_v28 }
 0x216   :  { %162 = vmin.xlane.f32.xlu1 %v161_v27 }
 0x29f   :  { %v163_v29 = vpop.xlane.xlu1 %162 }
 0x2a0   :  { %vm164_vm5 = vcmp.eq.f32.partialorder %v161_v27, %v163_v29  ;;  %v169_v32 = vcvt.f32.s32 %v163_v29 }
 0x2a1   :  { %v165_v31 = vsel %vm164_vm5, %v160_v30, inf }
 0x2a2   :  { %166 = vmin.xlane.f32.xlu0 %v165_v31  ;;  %v170_v34 = vshll.u32 %v169_v32, 16 }
 0x32b   :  { %v167_v33 = vpop.xlane.xlu0 %166 }
 0x32c   :  { %v168_v35 = vcvt.f32.s32 %v167_v33 }
 0x32e   :  { %v171_v36 = vadd.s32 %v170_v34, %v168_v35 }
 0x330   :  { %vm172_vm6 = vcmp.eq.s32.totalorder %v151_v22, %v171_v36  ;;  %v176_v59 = vsel %vm175_vm9, %v171_v36, 0 }
 0x331   :  { %v190_v37 = vsel %vm172_vm6, inf, %v149_v19  ;;  %v304_v43 = vsel %vm172_vm6, 1.0, %v457_v6 }
 0x332   :  { %v191_v38 = vsel %vm140_vm3, %v190_v37, inf  ;;  %v177_v45 = vmul.f32 %v304_v43, %v512_v17  ;;  %v182_v51 = vsel %vm140_vm3, %v304_v43, 0.0 }
 0x333   :  { %192 = vmin.xlane.f32.xlu1 %v191_v38  ;;  %v183_v53 = vrot.slane %v182_v51, 4 }
 0x334   :  { %v178_v46 = vsel %vm140_vm3, %v177_v45, 0.0 }
 0x335   :  { %v184_v57 = vadd.f32 %v183_v53, %v182_v51 }
 0x337   :  { %v185_v61 = vrot.slane %v184_v57, 2 }
 0x339   :  { %v186_v3 = vadd.f32 %v185_v61, %v184_v57 }
 0x33b   :  { %v187_v7 = vrot.slane %v186_v3, 1 }
 0x33d   :  { %v188_v10 = vadd.f32 %v187_v7, %v186_v3 }
 0x3bc   :  { %v193_v39 = vpop.xlane.xlu1 %192 }
 0x3bd   :  { %vm194_vm7 = vcmp.eq.f32.partialorder %v190_v37, %v193_v39 }
 0x3be   :  { %v195_v40 = vsel %vm194_vm7, %v151_v22, 8 }
 0x3bf   :  { %v196_v41 = vsel %vm140_vm3, %v195_v40, 2147483647 }
 0x3c0   :  { %v198_v42 = vshra.s32 %v196_v41, 16  ;;  %v197_v47 = vand.u32 65535, %v196_v41 }
 0x3c2   :  { %v200_v44 = vcvt.s32.f32 %v198_v42  ;;  %v199_v49 = vcvt.s32.f32 %v197_v47 }
 0x3c4   :  { %201 = vmin.xlane.f32.xlu0 %v200_v44 }
 0x3c8   :  { %179 = vadd.xlane.f32.xlu0 %v178_v46 }
 0x44d   :  { %v202_v48 = vpop.xlane.xlu0 %201 }
 0x44e   :  { %vm203_vm8 = vcmp.eq.f32.partialorder %v200_v44, %v202_v48  ;;  %v208_v52 = vcvt.f32.s32 %v202_v48 }
 0x44f   :  { %v204_v50 = vsel %vm203_vm8, %v199_v49, inf }
 0x450   :  { %205 = vmin.xlane.f32.xlu1 %v204_v50  ;;  %v209_v55 = vshll.u32 %v208_v52, 16 }
 0x4d9   :  { %v206_v54 = vpop.xlane.xlu1 %205 }
 0x4da   :  { %v207_v56 = vcvt.f32.s32 %v206_v54 }
 0x4dc   :  { %v210_v58 = vadd.s32 %v209_v55, %v207_v56 }
 0x4de   :  { %vm211_vm12 = vcmp.eq.s32.totalorder %v151_v22, %v210_v58  ;;  %v215_v60 = vsel %vm214_vm10, %v210_v58, %v176_v59 }
 0x4df   :  { %v305_v62 = vsel %vm211_vm12, 1.0, %v457_v6  ;;  %230 = vst.msk [vmem:[#allocation8] sm:$0x3] %vm229_vm11, %v215_v60 }
 0x4e0   :  { %v216_v63 = vmul.f32 %v305_v62, %v512_v17  ;;  %v221_v0 = vsel %vm140_vm3, %v305_v62, 0.0 }
 0x4e1   :  { %v222_v1 = vrot.slane %v221_v0, 4 }
 0x4e2   :  { %v217_v2 = vsel %vm140_vm3, %v216_v63, 0.0 }
 0x4e3   :  { %v223_v4 = vadd.f32 %v222_v1, %v221_v0  ;;  %218 = vadd.xlane.f32.xlu1 %v217_v2 }
 0x4e5   :  { %v224_v5 = vrot.slane %v223_v4, 2 }
 0x4e7   :  { %v225_v8 = vadd.f32 %v224_v5, %v223_v4 }
 0x4e9   :  { %v226_v9 = vrot.slane %v225_v8, 1 }
 0x4eb   :  { %v227_v11 = vadd.f32 %v226_v9, %v225_v8 }
 0x4ed   :  { %v228_v12 = vadd.f32 %v227_v11, %v188_v10 }
 0x4ef   :  { %232 = vst.msk [vmem:[#allocation10] sm:$0x1] %vm231_vm13, %v228_v12 }
 0x4f0   :  { %376 = shalt.err (!%p373_p0)
}
 0x4f1   :  { %263 = dma.vmem_to_hbm [thread:$0]  %s261_s7, 32, %s545_s4, [#allocation9]  }
 0x4f2   :  { %s385_s13 = scalar_lea.vmem %s251_s9, 32  ;;  %p390_p2 = scmp.lt.s32.totalorder %s251_s9, %s251_s9 }
 0x4f3   :  { %p386_p1 = scmp.ne.s32.totalorder %s251_s9, %s385_s13  ;;  %p391_p3 = scmp.lt.s32.totalorder %s385_s13, %s385_s13 }
 0x4f5   :  { %p392_p4 = por %p391_p3, %p390_p2 }
 0x4f7   :  { %p393_p5 = pnand %p392_p4, %p386_p1 }
 0x4f9   :  { %396 = shalt.err (!%p393_p5)
}
 0x4fa   :  { %253 = dma.vmem_to_hbm [thread:$0]  %s251_s9, 32, %s544_s3, [#allocation4]  }
 0x4fb   :  { %s461_s16 = smov [#allocation10]  }
 0x4fc   :  { %s270_s17 = sshll.u32 %s461_s16, 4  ;;  %s271_s17 = int_to_ptr.vmem [resolvable:$true] %s270_s17 }
 0x4fd   :  { %s405_s18 = scalar_lea.vmem %s271_s17, 16  ;;  %s409_s19 = scalar_lea.vmem %s271_s17, 32 }
 0x4fe   :  { %p406_p6 = scmp.ne.s32.totalorder %s271_s17, %s405_s18  ;;  %p410_p7 = scmp.lt.s32.totalorder %s271_s17, %s271_s17 }
 0x4ff   :  { %p411_p8 = scmp.lt.s32.totalorder %s409_s19, %s405_s18 }
 0x501   :  { %p412_p9 = por %p411_p8, %p410_p7 }
 0x503   :  { %p413_p10 = pnand %p412_p9, %p406_p6 }
 0x505   :  { %416 = shalt.err (!%p413_p10)
}
 0x506   :  { %273 = dma.vmem_to_hbm [thread:$0]  %s271_s17, 16, %s546_s5, [#allocation9]   ;;  %v180_v6 = vpop.xlane.xlu0 %179  ;;  %vm233_vm14 = vcmask 1041408   ;;  %vm242_vm15 = vcmask 0  }
 0x507   :  { %s462_s3 = smov [#allocation11]  }
 0x508   :  { %s280_s21 = sshll.u32 %s462_s3, 4  ;;  %s281_s21 = int_to_ptr.vmem [resolvable:$true] %s280_s21 }
 0x509   :  { %s425_s22 = scalar_lea.vmem %s281_s21, 16  ;;  %s429_s5 = scalar_lea.vmem %s281_s21, 32 }
 0x50a   :  { %p426_p11 = scmp.ne.s32.totalorder %s281_s21, %s425_s22  ;;  %p430_p12 = scmp.lt.s32.totalorder %s281_s21, %s281_s21 }
 0x50b   :  { %p431_p13 = scmp.lt.s32.totalorder %s429_s5, %s425_s22 }
 0x50d   :  { %p432_p0 = por %p431_p13, %p430_p12 }
 0x50f   :  { %p433_p1 = pnand %p432_p0, %p426_p11 }
 0x56c   :  { %v219_v13 = vpop.xlane.xlu1 %218 }
 0x56d   :  { %v220_v14 = vadd.f32 %v219_v13, %v180_v6 }
 0x56f   :  { %v234_v15 = vsel %vm233_vm14, %v220_v14, 0.0 }
 0x570   :  { %v235_v16 = vrot.slane %v234_v15, 4 }
 0x572   :  { %v236_v17 = vadd.f32 %v235_v16, %v234_v15 }
 0x574   :  { %v237_v18 = vrot.slane %v236_v17, 2 }
 0x576   :  { %v238_v19 = vadd.f32 %v237_v18, %v236_v17 }
 0x578   :  { %v239_v20 = vrot.slane %v238_v19, 1 }
 0x57a   :  { %v240_v21 = vadd.f32 %v239_v20, %v238_v19 }
 0x57c   :  { %v241_v22 = vmul.f32 0.5, %v240_v21 }
 0x57e   :  { %243 = vst.msk [vmem:[#allocation11] sm:$0x1] %vm242_vm15, %v241_v22 }
 0x57f   :  { %436 = shalt.err (!%p433_p1)
}
 0x580   :  { %283 = dma.vmem_to_hbm [thread:$0]  %s281_s21, 16, %s547_s6, [#allocation12]  }
 0x581   :  { %449 = dma.done.wait [#allocation4], 32  }
 0x582   :  { %450 = vsyncadd [#allocation4], 4294967264 }
 0x583   :  { %451 = dma.done.wait [#allocation9], 48  }
 0x584   :  { %452 = vsyncadd [#allocation9], 4294967248 }
 0x585   :  { %453 = dma.done.wait [#allocation12], 16  }
 0x586   :  { %454 = vsyncadd [#allocation12], 4294967280 }
 0x587   :  { %296 = vsyncpa [#allocation3], 1 }
 0x588   :  { %297 = vsyncpa [#allocation6], 1 }
 0x589   :  { %298 = vsyncpa [#allocation4], 1 }
 0x58a   :  { %299 = vsyncpa [#allocation9], 1 }
 0x58b   :  { %300 = vsyncpa [#allocation12], 1 }

</bundles_post_ra>
